<compile_context>
chip_gen: v7x
topology: tpu7x:2x2x1
jax: 0.10.0
libtpu: 0.0.40
codegen_flags: <defaults>
</compile_context>

<pallas_src>
import functools

import jax
import jax.numpy as jnp
from jax.experimental import pallas as pl
from jax.experimental.pallas import tpu as pltpu


def _ca_kernel(x_ref, w_ref, b_ref, eps_ref, o_ref, *, fout):
    # One fused MXU matmul: [tb, Fin] @ [Fin, 2*Fout] -> [tb, 2*Fout] (f32 acc).
    z = jnp.dot(x_ref[...], w_ref[...], preferred_element_type=jnp.float32)
    z = z + b_ref[...].astype(jnp.float32)          # fused bias add (f32 epilogue)
    z_mean = z[:, :fout]                            # static slice at 128-lane boundary
    z_var = z[:, fout:]
    y = z_mean + z_var * eps_ref[...].astype(jnp.float32)
    o_ref[...] = y.astype(o_ref.dtype)


def ca_layer_forward(x_nchw, wm, bm, wv, bv, eps, *, tb=None, matmul_dtype=None):
    """x_nchw: [B, Fin, 1, 1];  wm/wv: [Fin, Fout] (pre-transposed vs. nn.Linear);
    bm/bv: [1, Fout];  eps: [B, Fout] standard-normal noise.
    Returns [B, Fout, 1, 1].  matmul_dtype=jnp.bfloat16 enables the bf16-operand
    MXU path (f32 accumulation + f32 epilogue)."""
    B, fin = x_nchw.shape[0], x_nchw.shape[1]
    fout = wm.shape[1]
    x = x_nchw.reshape(B, fin)                      # squeeze()

    # Fuse the two linear layers into one matmul + one bias add.
    w = jnp.concatenate([wm, wv], axis=1)                               # (Fin, 2*Fout)
    b = jnp.concatenate([bm.reshape(1, fout), bv.reshape(1, fout)], 1)  # (1, 2*Fout)

    if matmul_dtype is not None:
        x_mm = x.astype(matmul_dtype)
        w = w.astype(matmul_dtype)
    else:
        x_mm = x

    # Batch tile: whole (sublane-padded) batch when small, else 128 rows.
    b_pad8 = ((B + 7) // 8) * 8
    if tb is None:
        tb = min(128, b_pad8)
    assert tb % 8 == 0, "tb must be a multiple of 8 (sublane constraint)"
    b_pad = pl.cdiv(B, tb) * tb

    if b_pad != B:
        x_mm = jnp.pad(x_mm, ((0, b_pad - B), (0, 0)))
        eps_p = jnp.pad(eps, ((0, b_pad - B), (0, 0)))
    else:
        eps_p = eps

    y = pl.pallas_call(
        functools.partial(_ca_kernel, fout=fout),
        out_shape=jax.ShapeDtypeStruct((b_pad, fout), x_nchw.dtype),
        grid=(b_pad // tb,),
        in_specs=[
            pl.BlockSpec((tb, fin), lambda i: (i, 0)),        # x tile
            pl.BlockSpec((fin, 2 * fout), lambda i: (0, 0)),  # fused [Wm|Wv]
            pl.BlockSpec((1, 2 * fout), lambda i: (0, 0)),    # fused [bm|bv]
            pl.BlockSpec((tb, fout), lambda i: (i, 0)),       # eps tile
        ],
        out_specs=pl.BlockSpec((tb, fout), lambda i: (i, 0)),
        compiler_params=pltpu.CompilerParams(
            dimension_semantics=("parallel",)),
    )(x_mm, w, b, eps_p)

    return y[:B].reshape(B, fout, 1, 1)             # unsqueeze(2), unsqueeze(3)


if __name__ == "__main__":
    # Small shapes consistent with the module: x is [B, in_features, 1, 1].
    # B=6 is deliberately not a multiple of 8 to exercise the padding path.
    B, IN_F, OUT_F = 6, 128, 128
    key = jax.random.PRNGKey(0)
    kx, kwm, kbm, kwv, kbv, keps = jax.random.split(key, 6)

    x = jax.random.normal(kx, (B, IN_F, 1, 1), dtype=jnp.float32)

    # Deterministic parameter init mimicking nn.Linear default:
    # U(-1/sqrt(in_features), 1/sqrt(in_features)); weights stored [in, out].
    bound = 1.0 / (IN_F ** 0.5)
    wm = jax.random.uniform(kwm, (IN_F, OUT_F), jnp.float32, -bound, bound)
    bm = jax.random.uniform(kbm, (1, OUT_F), jnp.float32, -bound, bound)
    wv = jax.random.uniform(kwv, (IN_F, OUT_F), jnp.float32, -bound, bound)
    bv = jax.random.uniform(kbv, (1, OUT_F), jnp.float32, -bound, bound)

    # Standard-normal noise for the reparameterized torch.normal(mean, std).
    eps = jax.random.normal(keps, (B, OUT_F), dtype=jnp.float32)

    # Pure-JAX reference.
    x2 = x.reshape(B, IN_F)
    z_mean_ref = x2 @ wm + bm
    z_var_ref = x2 @ wv + bv
    y_ref = (z_mean_ref + z_var_ref * eps).reshape(B, OUT_F, 1, 1)

    # f32 MXU path: exact match against reference.
    y_f32 = jax.block_until_ready(ca_layer_forward(x, wm, bm, wv, bv, eps))
    assert y_f32.shape == (B, OUT_F, 1, 1)
    assert jnp.allclose(y_f32, y_ref, atol=1e-5, rtol=1e-5)

    # bf16-operand MXU path (v6e/v7x fast path), f32 accumulation + epilogue.
    y_bf16 = jax.block_until_ready(
        ca_layer_forward(x, wm, bm, wv, bv, eps, matmul_dtype=jnp.bfloat16))
    assert y_bf16.shape == (B, OUT_F, 1, 1)
    assert jnp.allclose(y_bf16, y_ref, atol=5e-2, rtol=5e-2)

    print("KERNEL_OK")
</pallas_src>

<mosaic_0001>
module attributes {stable_mosaic.version = 11 : i64} {
  func.func @_ca_kernel(%arg0: i32, %arg1: memref<8x128xf32, #tpu.memory_space<vmem>>, %arg2: memref<128x256xf32, #tpu.memory_space<vmem>>, %arg3: memref<1x256xf32, #tpu.memory_space<vmem>>, %arg4: memref<8x128xf32, #tpu.memory_space<vmem>>, %arg5: memref<8x128xf32, #tpu.memory_space<vmem>>) attributes {dimension_semantics = [#tpu.dimension_semantics<parallel>], iteration_bounds = array<i64: 1>, scalar_prefetch = 0 : i64, scratch_operands = 0 : i64, tpu.core_type = #tpu.core_type<tc>, window_params = [{transform_indices = @transform_0, window_bounds = array<i64: 8, 128>}, {pipeline_mode = #tpu.pipeline_mode<synchronous>, transform_indices = @transform_1, window_bounds = array<i64: 128, 256>}, {pipeline_mode = #tpu.pipeline_mode<synchronous>, transform_indices = @transform_2, window_bounds = array<i64: 1, 256>}, {transform_indices = @transform_3, window_bounds = array<i64: 8, 128>}, {transform_indices = @transform_4, window_bounds = array<i64: 8, 128>}]} {
    %c0 = arith.constant 0 : index
    %c0_0 = arith.constant 0 : index
    %0 = vector.load %arg1[%c0, %c0_0] : memref<8x128xf32, #tpu.memory_space<vmem>>, vector<8x128xf32>
    %c0_1 = arith.constant 0 : index
    %c0_2 = arith.constant 0 : index
    %1 = vector.load %arg2[%c0_1, %c0_2] : memref<128x256xf32, #tpu.memory_space<vmem>>, vector<128x256xf32>
    %cst = arith.constant dense<0.000000e+00> : vector<8x256xf32>
    %2 = tpu.matmul %0, %1, %cst {dimension_numbers = #tpu.dot_dimension_numbers<[1], [0], [0], [1], [0, 0, 1, 1], [], []>} : vector<8x128xf32>, vector<128x256xf32>, vector<8x256xf32> -> vector<8x256xf32>
    %c0_3 = arith.constant 0 : index
    %c0_4 = arith.constant 0 : index
    %3 = vector.load %arg3[%c0_3, %c0_4] : memref<1x256xf32, #tpu.memory_space<vmem>>, vector<1x256xf32>
    %4 = vector.broadcast %3 : vector<1x256xf32> to vector<8x256xf32>
    %5 = arith.addf %2, %4 : vector<8x256xf32>
    %6 = vector.extract_strided_slice %5 {offsets = [0, 0], sizes = [8, 128], strides = [1, 1]} : vector<8x256xf32> to vector<8x128xf32>
    %7 = vector.extract_strided_slice %5 {offsets = [0, 128], sizes = [8, 128], strides = [1, 1]} : vector<8x256xf32> to vector<8x128xf32>
    %c0_5 = arith.constant 0 : index
    %c0_6 = arith.constant 0 : index
    %8 = vector.load %arg4[%c0_5, %c0_6] : memref<8x128xf32, #tpu.memory_space<vmem>>, vector<8x128xf32>
    %9 = arith.mulf %7, %8 : vector<8x128xf32>
    %10 = arith.addf %6, %9 : vector<8x128xf32>
    %c0_7 = arith.constant 0 : index
    %c0_8 = arith.constant 0 : index
    %11 = vector.load %arg5[%c0_7, %c0_8] : memref<8x128xf32, #tpu.memory_space<vmem>>, vector<8x128xf32>
    tpu.vector_store %arg5[%c0_7, %c0_8], %10 {strides = array<i32>} : memref<8x128xf32, #tpu.memory_space<vmem>>, vector<8x128xf32>,
    return
  }
  func.func @transform_0(%arg0: i32) -> (i32, i32) {
    %c0_i32 = arith.constant 0 : i32
    %c0_i32_0 = arith.constant 0 : i32
    return %arg0, %c0_i32 : i32, i32
  }
  func.func @transform_1(%arg0: i32) -> (i32, i32) {
    %c0_i32 = arith.constant 0 : i32
    %c0_i32_0 = arith.constant 0 : i32
    %c0_i32_1 = arith.constant 0 : i32
    return %c0_i32, %c0_i32_0 : i32, i32
  }
  func.func @transform_2(%arg0: i32) -> (i32, i32) {
    %c0_i32 = arith.constant 0 : i32
    %c0_i32_0 = arith.constant 0 : i32
    %c0_i32_1 = arith.constant 0 : i32
    return %c0_i32, %c0_i32_0 : i32, i32
  }
  func.func @transform_3(%arg0: i32) -> (i32, i32) {
    %c0_i32 = arith.constant 0 : i32
    %c0_i32_0 = arith.constant 0 : i32
    return %arg0, %c0_i32 : i32, i32
  }
  func.func @transform_4(%arg0: i32) -> (i32, i32) {
    %c0_i32 = arith.constant 0 : i32
    %c0_i32_0 = arith.constant 0 : i32
    return %arg0, %c0_i32 : i32, i32
  }
}

</mosaic_0001>

<bundles_post_ra>
// kernel: tpu_custom_call.1
= control target key start
LH: loop header
LB: loop body
LE: loop exit
PB: predicated region body
PF: predicated region fallthrough
CT: control target
= control target key end

     0   :  { %9 = vsyncpa [#allocation3], 0  ;;  %s370_s0 = inlined_call_operand.hbm [shape: f32[8,128], index: 0, kind: input, shape index: {}]   ;;  %s371_s1 = inlined_call_operand.hbm [shape: f32[128,256], index: 1, kind: input, shape index: {}]   ;;  %s372_s2 = inlined_call_operand.vmem [shape: f32[1,256], index: 2, kind: input, shape index: {}]   ;;  %s373_s3 = inlined_call_operand.vmem [shape: f32[8,128], index: 3, kind: input, shape index: {}]   ;;  %s374_s4 = inlined_call_operand.hbm [shape: f32[8,128], index: 4, kind: output, shape index: {}]  }
   0x1   :  { %10 = vsyncpa [#allocation6], 0 }
   0x2   :  { %11 = vsyncpa [#allocation4], 0  ;;  %s290_s15 = smov [#allocation2]   ;;  %s291_s17 = smov [#allocation5]  }
   0x3   :  { %s18_s16 = sshll.u32 %s290_s15, 4  ;;  %s27_s18 = sshll.u32 %s291_s17, 4  ;;  %s19_s16 = int_to_ptr.vmem [resolvable:$true] %s18_s16  ;;  %s321_s18 = int_to_ptr.vmem [resolvable:$true] %s27_s18 }
   0x4   :  { %s218_s21 = scalar_lea.hbm %s370_s0, 128 }
   0x5   :  { %p219_p0 = scmp.ne.s32.totalorder %s370_s0, %s218_s21  ;;  %p222_p1 = scmp.lt.u32.totalorder %s218_s21, %s370_s0 }
   0x7   :  { %p224_p2 = pnand %p222_p1, %p219_p0 }
   0x9   :  { %227 = shalt.err (!%p224_p2)
}
   0xa   :  { %s228_s26 = scalar_lea.vmem %s19_s16, 128  ;;  %p233_p4 = scmp.lt.s32.totalorder %s19_s16, %s19_s16 }
   0xb   :  { %p229_p3 = scmp.ne.s32.totalorder %s19_s16, %s228_s26  ;;  %p234_p5 = scmp.lt.s32.totalorder %s228_s26, %s228_s26 }
   0xd   :  { %p235_p6 = por %p234_p5, %p233_p4 }
   0xf   :  { %p236_p7 = pnand %p235_p6, %p229_p3 }
  0x11   :  { %239 = shalt.err (!%p236_p7)
}
  0x12   :  { %21 = dma.hbm_to_vmem [thread:$0]  %s370_s0, 128, %s19_s16, [#allocation3]  }
  0x13   :  { %s240_s5 = scalar_lea.hbm %s371_s1, 4096 }
  0x14   :  { %p241_p8 = scmp.ne.s32.totalorder %s371_s1, %s240_s5  ;;  %p244_p9 = scmp.lt.u32.totalorder %s240_s5, %s371_s1 }
  0x16   :  { %p246_p10 = pnand %p244_p9, %p241_p8 }
  0x18   :  { %249 = shalt.err (!%p246_p10)
}
  0x19   :  { %s250_s10 = scalar_lea.vmem %s321_s18, 4096  ;;  %p255_p12 = scmp.lt.s32.totalorder %s321_s18, %s321_s18 }
  0x1a   :  { %p251_p11 = scmp.ne.s32.totalorder %s321_s18, %s250_s10  ;;  %p256_p13 = scmp.lt.s32.totalorder %s250_s10, %s250_s10 }
  0x1c   :  { %p257_p0 = por %p256_p13, %p255_p12 }
  0x1e   :  { %p258_p1 = pnand %p257_p0, %p251_p11 }
  0x20   :  { %261 = shalt.err (!%p258_p1)
}
  0x21   :  { %s292_s0 = smov 256   ;;  %s293_s11 = smov 16  }
  0x22   :  { %33 = dma.hbm_to_vmem [thread:$0]  %s371_s1, 4096, %s321_s18, [#allocation6], %s292_s0, %s292_s0, %s293_s11  }
  0x23   :  { %284 = dma.done.wait [#allocation3], 128  }
  0x24   :  { %285 = vsyncadd [#allocation3], 4294967168 }
  0x25   :  { %286 = dma.done.wait [#allocation6], 4096  }
  0x26   :  { %287 = vsyncadd [#allocation6], 4294963200  ;;  %v294_v0 = vmov 0.0   ;;  %v46_v1 = vld [vmem:[#allocation5 + $0x8] sm:$0xff]  ;;  %v48_v2 = vld [vmem:[#allocation5 + $0x18] sm:$0xff]  ;;  %v79_v50 = vlaneseq  ;;  %s295_s17 = smov [#allocation7]  }
  0x27   :  { %153 = vmatprep.mubr.f32.mxu0 %v294_v0  ;;  %v45_v3 = vld [vmem:[#allocation5] sm:$0xff]  ;;  %v180_v4 = vpack.c.bf16 %v48_v2, %v46_v1  ;;  %v47_v5 = vld [vmem:[#allocation5 + $0x10] sm:$0xff]  ;;  %v50_v6 = vld [vmem:[#allocation5 + $0x28] sm:$0xff]  ;;  %s170_s18 = sshll.u32 %s295_s17, 4  ;;  %s171_s18 = int_to_ptr.vmem [resolvable:$true] %s170_s18 }
  0x28   :  { %v52_v7 = vld [vmem:[#allocation5 + $0x38] sm:$0xff]  ;;  %v182_v8 = vpack.c.bf16 %v47_v5, %v45_v3  ;;  %v49_v10 = vld [vmem:[#allocation5 + $0x20] sm:$0xff]  ;;  %v51_v11 = vld [vmem:[#allocation5 + $0x30] sm:$0xff]  ;;  %v80_v51 = vshrl.u32 %v79_v50, 7  ;;  %s262_s19 = scalar_lea.vmem %s171_s18, 128  ;;  %p267_p3 = scmp.lt.s32.totalorder %s171_s18, %s171_s18 }
  0x29   :  { %v184_v9 = vpack.c.bf16 %v52_v7, %v50_v6  ;;  %v54_v12 = vld [vmem:[#allocation5 + $0x48] sm:$0xff]  ;;  %181 = vmatprep.subr.bf16.mxu0 %v180_v4  ;;  %v56_v13 = vld [vmem:[#allocation5 + $0x58] sm:$0xff]  ;;  %v186_v14 = vpack.c.bf16 %v51_v11, %v49_v10  ;;  %v53_v16 = vld [vmem:[#allocation5 + $0x40] sm:$0xff]  ;;  %p263_p2 = scmp.ne.s32.totalorder %s171_s18, %s262_s19  ;;  %p268_p4 = scmp.lt.s32.totalorder %s262_s19, %s262_s19 }
  0x2a   :  { %183 = vmatpush1.bf16.msra.mxu0 %v182_v8  ;;  %v188_v15 = vpack.c.bf16 %v56_v13, %v54_v12  ;;  %v55_v17 = vld [vmem:[#allocation5 + $0x50] sm:$0xff]  ;;  %v58_v18 = vld [vmem:[#allocation5 + $0x68] sm:$0xff]  ;;  %v60_v19 = vld [vmem:[#allocation5 + $0x78] sm:$0xff]  ;;  %v85_v52 = vsub.s32 1, %v80_v51  ;;  %v81_v54 = vsub.s32 0, %v80_v51 }
  0x2b   :  { %185 = vmatprep.subr.bf16.mxu0 %v184_v9  ;;  %v190_v20 = vpack.c.bf16 %v55_v17, %v53_v16  ;;  %v192_v21 = vpack.c.bf16 %v60_v19, %v58_v18  ;;  %v57_v22 = vld [vmem:[#allocation5 + $0x60] sm:$0xff]  ;;  %v59_v23 = vld [vmem:[#allocation5 + $0x70] sm:$0xff]  ;;  %v62_v24 = vld [vmem:[#allocation5 + $0x88] sm:$0xff]  ;;  %p269_p5 = por %p268_p4, %p267_p3 }
  0x2c   :  { %v64_v25 = vld [vmem:[#allocation5 + $0x98] sm:$0xff]  ;;  %v194_v26 = vpack.c.bf16 %v59_v23, %v57_v22  ;;  %v61_v28 = vld [vmem:[#allocation5 + $0x80] sm:$0xff]  ;;  %v63_v29 = vld [vmem:[#allocation5 + $0x90] sm:$0xff] }
  0x2d   :  { %v196_v27 = vpack.c.bf16 %v64_v25, %v62_v24  ;;  %v66_v30 = vld [vmem:[#allocation5 + $0xa8] sm:$0xff]  ;;  %v68_v31 = vld [vmem:[#allocation5 + $0xb8] sm:$0xff]  ;;  %v198_v32 = vpack.c.bf16 %v63_v29, %v61_v28  ;;  %v65_v34 = vld [vmem:[#allocation5 + $0xa0] sm:$0xff]  ;;  %p270_p6 = pnand %p269_p5, %p263_p2 }
  0x2e   :  { %187 = vmatpush1.bf16.msra.mxu0 %v186_v14  ;;  %v200_v33 = vpack.c.bf16 %v68_v31, %v66_v30  ;;  %v67_v35 = vld [vmem:[#allocation5 + $0xb0] sm:$0xff]  ;;  %v70_v36 = vld [vmem:[#allocation5 + $0xc8] sm:$0xff]  ;;  %v72_v37 = vld [vmem:[#allocation5 + $0xd8] sm:$0xff] }
  0x2f   :  { %189 = vmatprep.subr.bf16.mxu0 %v188_v15  ;;  %v202_v38 = vpack.c.bf16 %v67_v35, %v65_v34  ;;  %v204_v39 = vpack.c.bf16 %v72_v37, %v70_v36  ;;  %v69_v40 = vld [vmem:[#allocation5 + $0xc0] sm:$0xff]  ;;  %v71_v41 = vld [vmem:[#allocation5 + $0xd0] sm:$0xff]  ;;  %v74_v42 = vld [vmem:[#allocation5 + $0xe8] sm:$0xff] }
  0x30   :  { %v76_v43 = vld [vmem:[#allocation5 + $0xf8] sm:$0xff]  ;;  %v206_v44 = vpack.c.bf16 %v71_v41, %v69_v40  ;;  %v73_v46 = vld [vmem:[#allocation5 + $0xe0] sm:$0xff]  ;;  %v75_v47 = vld [vmem:[#allocation5 + $0xf0] sm:$0xff] }
  0x31   :  { %v208_v45 = vpack.c.bf16 %v76_v43, %v74_v42  ;;  %v210_v48 = vpack.c.bf16 %v75_v47, %v73_v46  ;;  %v44_v49 = vld [vmem:[#allocation2] sm:$0xff] }
  0x32   :  { %191 = vmatpush1.bf16.msra.mxu0 %v190_v20  ;;  %v77_v53 = vld [vmem:[%s372_s2] sm:$0x3] }
  0x33   :  { %193 = vmatprep.subr.bf16.mxu0 %v192_v21  ;;  %v86_v55 = vrot.slane %v77_v53, %v85_v52  ;;  %v82_v56 = vrot.slane %v77_v53, %v81_v54  ;;  %v160_v59 = vld [vmem:[%s373_s3] sm:$0xff] }
  0x36   :  { %195 = vmatpush1.bf16.msra.mxu0 %v194_v26 }
  0x37   :  { %197 = vmatprep.subr.bf16.mxu0 %v196_v27 }
  0x3a   :  { %199 = vmatpush1.bf16.msra.mxu0 %v198_v32 }
  0x3b   :  { %201 = vmatprep.subr.bf16.mxu0 %v200_v33 }
  0x3e   :  { %203 = vmatpush1.bf16.msra.mxu0 %v202_v38 }
  0x3f   :  { %205 = vmatprep.subr.bf16.mxu0 %v204_v39 }
  0x42   :  { %207 = vmatpush1.bf16.msra.mxu0 %v206_v44 }
  0x43   :  { %209 = vmatprep.subr.bf16.mxu0 %v208_v45 }
  0x46   :  { %211 = vmatpush1.bf16.msra.mxu0 %v210_v48 }
  0x49   :  { %154 = vmatmul.mubr.f32.vlgmr.msra.gmra.mrb[0].mxu0 %v44_v49 }
 0x11c   :  { %v155_v57 = vpop.f32.mrb[0].mxu0 }
 0x11d   :  { %v157_v58 = vpop.f32.mrb[1].mxu0  ;;  %v156_v61 = vadd.f32 %v155_v57, %v82_v56 }
 0x11e   :  { %v158_v60 = vadd.f32 %v157_v58, %v86_v55 }
 0x120   :  { %v161_v62 = vmul.f32 %v160_v59, %v158_v60 }
 0x122   :  { %v162_v63 = vadd.f32 %v161_v62, %v156_v61 }
 0x124   :  { %163 = vst [vmem:[#allocation7] sm:$0xff] %v162_v63 }
 0x125   :  { %273 = shalt.err (!%p270_p6)
}
 0x126   :  { %s274_s21 = scalar_lea.hbm %s374_s4, 128 }
 0x127   :  { %p275_p7 = scmp.ne.s32.totalorder %s374_s4, %s274_s21  ;;  %p278_p8 = scmp.lt.u32.totalorder %s274_s21, %s374_s4 }
 0x129   :  { %p280_p9 = pnand %p278_p8, %p275_p7 }
 0x12b   :  { %283 = shalt.err (!%p280_p9)
}
 0x12c   :  { %173 = dma.vmem_to_hbm [thread:$0]  %s171_s18, 128, %s374_s4, [#allocation4]  }
 0x12d   :  { %288 = dma.done.wait [#allocation4], 128  }
 0x12e   :  { %289 = vsyncadd [#allocation4], 4294967168 }
 0x12f   :  { %177 = vsyncpa [#allocation3], 1 }
 0x130   :  { %178 = vsyncpa [#allocation6], 1 }
 0x131   :  { %179 = vsyncpa [#allocation4], 1 }

</bundles_post_ra>
